<compile_context>
chip_gen: v7x
topology: tpu7x:2x2x1
jax: 0.10.0
libtpu: 0.0.40
codegen_flags: <defaults>
</compile_context>

<pallas_src>
import jax
import jax.numpy as jnp
from jax.experimental import pallas as pl
from jax.experimental.pallas import tpu as pltpu


def _sigmoid(x):
    return 1.0 / (1.0 + jnp.exp(-x))


def decoder_e_kernel(vg_ref, cd_ref, h0_ref, c0_ref,
                     wa_ref, ba_ref, wih_a_ref, wih_v_ref, whh_ref, b_ref,
                     h_out_ref, c_out_ref):
    # vg_ref   : [BT, E]   v_g (seq dim squeezed)
    # cd_ref   : [BT, H]   cell_d (seq dim squeezed)
    # h0/c0    : [BT, H]   previous LSTM state (zeros if states=None)
    # wa_ref   : [H, E]    affine_a weight (pre-transposed vs torch)
    # ba_ref   : [1, E]    affine_a bias
    # wih_a_ref: [E, 4H]   LSTM weight_ih_l0 rows acting on affine_a output
    # wih_v_ref: [E, 4H]   LSTM weight_ih_l0 rows acting on v_g
    # whh_ref  : [H, 4H]   LSTM weight_hh_l0 (pre-transposed), gate order i|f|g|o
    # b_ref    : [1, 4H]   b_ih + b_hh (pre-summed)
    f32 = jnp.float32
    vg = vg_ref[...].astype(f32)
    cd = cd_ref[...].astype(f32)
    h0 = h0_ref[...].astype(f32)
    c0 = c0_ref[...].astype(f32)

    # affine_a(cell_d)
    a = jnp.dot(cd, wa_ref[...].astype(f32),
                preferred_element_type=f32) + ba_ref[...].astype(f32)       # [BT, E]

    # cat((a, v_g), dim=-1) @ W_ih  ==  a @ W_ih[:E] + v_g @ W_ih[E:]
    gates = (jnp.dot(a, wih_a_ref[...].astype(f32), preferred_element_type=f32)
             + jnp.dot(vg, wih_v_ref[...].astype(f32), preferred_element_type=f32)
             + jnp.dot(h0, whh_ref[...].astype(f32), preferred_element_type=f32)
             + b_ref[...].astype(f32))                                       # [BT, 4H]

    H = h0.shape[-1]
    i_g = _sigmoid(gates[:, 0 * H:1 * H])
    f_g = _sigmoid(gates[:, 1 * H:2 * H])
    g_g = jnp.tanh(gates[:, 2 * H:3 * H])
    o_g = _sigmoid(gates[:, 3 * H:4 * H])

    c_t = f_g * c0 + i_g * g_g
    h_t = o_g * jnp.tanh(c_t)

    h_out_ref[...] = h_t.astype(h_out_ref.dtype)
    c_out_ref[...] = c_t.astype(c_out_ref.dtype)


def decoder_e_forward(v_g, cell_d, wa, ba, w_ih, w_hh, b_ih, b_hh, states=None):
    """v_g: [B,1,E]; cell_d: [B,1,H]; wa: [H,E]; ba: [E];
    w_ih: [2E,4H]; w_hh: [H,4H]; b_ih/b_hh: [4H];
    states: optional (h0, c0) each [1,B,H]."""
    B, S, E = v_g.shape
    H = cell_d.shape[2]
    assert S == 1 and cell_d.shape[1] == 1  # mirrors `assert cell_d.size(1) == 1`

    if states is None:
        h0 = jnp.zeros((B, H), dtype=jnp.float32)
        c0 = jnp.zeros((B, H), dtype=jnp.float32)
    else:
        h0 = states[0].reshape(B, H)
        c0 = states[1].reshape(B, H)

    vg2 = v_g.reshape(B, E)              # layout-free reshapes only (no transposes)
    cd2 = cell_d.reshape(B, H)
    ba2 = ba.reshape(1, E)
    wih_a = w_ih[:E, :]                  # split once in the wrapper, not in-kernel
    wih_v = w_ih[E:, :]
    b_sum = (b_ih + b_hh).reshape(1, 4 * H)

    # Batch tile: whole batch for small B; cap for large B (still satisfies the
    # (8,128) rule since the trailing dims equal the full array dims).
    bt = B if B <= 256 else 256
    grid = (pl.cdiv(B, bt),)

    def bspec(shape):
        return pl.BlockSpec(shape, lambda i: (i, 0))      # batch-tiled

    def wspec(shape):
        return pl.BlockSpec(shape, lambda i: (0, 0))      # replicated weights

    h_t, c_t = pl.pallas_call(
        decoder_e_kernel,
        out_shape=(jax.ShapeDtypeStruct((B, H), jnp.float32),
                   jax.ShapeDtypeStruct((B, H), jnp.float32)),
        grid=grid,
        in_specs=[
            bspec((bt, E)),            # v_g
            bspec((bt, H)),            # cell_d
            bspec((bt, H)),            # h0
            bspec((bt, H)),            # c0
            wspec((H, E)),             # affine_a weight
            wspec((1, E)),             # affine_a bias
            wspec((E, 4 * H)),         # LSTM W_ih (affine_a half)
            wspec((E, 4 * H)),         # LSTM W_ih (v_g half)
            wspec((H, 4 * H)),         # LSTM W_hh
            wspec((1, 4 * H)),         # LSTM b_ih + b_hh
        ],
        out_specs=(pl.BlockSpec((bt, H), lambda i: (i, 0)),
                   pl.BlockSpec((bt, H), lambda i: (i, 0))),
        compiler_params=pltpu.CompilerParams(
            dimension_semantics=("parallel",)),
    )(vg2, cd2, h0, c0, wa, ba2, wih_a, wih_v, w_hh, b_sum)

    hiddens = h_t.reshape(B, 1, H)                      # hiddens[:, 0, :] = h_t
    new_states = (h_t.reshape(1, B, H), c_t.reshape(1, B, H))
    return hiddens, new_states


def reference_decoder_e(v_g, cell_d, wa, ba, w_ih, w_hh, b_ih, b_hh, states=None):
    B, _, E = v_g.shape
    H = cell_d.shape[2]
    if states is None:
        h0 = jnp.zeros((B, H), jnp.float32)
        c0 = jnp.zeros((B, H), jnp.float32)
    else:
        h0 = states[0].reshape(B, H)
        c0 = states[1].reshape(B, H)
    a = cell_d.reshape(B, H) @ wa + ba                              # affine_a
    x = jnp.concatenate([a, v_g.reshape(B, E)], axis=-1)            # cat dim=2
    gates = x @ w_ih + b_ih + h0 @ w_hh + b_hh
    i = jax.nn.sigmoid(gates[:, 0 * H:1 * H])
    f = jax.nn.sigmoid(gates[:, 1 * H:2 * H])
    g = jnp.tanh(gates[:, 2 * H:3 * H])
    o = jax.nn.sigmoid(gates[:, 3 * H:4 * H])
    c = f * c0 + i * g
    h = o * jnp.tanh(c)
    return h.reshape(B, 1, H), (h.reshape(1, B, H), c.reshape(1, B, H))


if __name__ == "__main__":
    key = jax.random.PRNGKey(0)
    ks = jax.random.split(key, 8)

    B, embed_size, hidden_size = 2, 32, 32
    E, H = embed_size, hidden_size

    v_g = jax.random.normal(ks[0], (B, 1, E), dtype=jnp.float32)
    cell_d = jax.random.normal(ks[1], (B, 1, H), dtype=jnp.float32)

    # affine_a: kaiming-normal weight (initweights), zero bias; stored pre-transposed [H, E].
    wa = jax.random.normal(ks[2], (H, E), dtype=jnp.float32) * jnp.sqrt(2.0 / H)
    ba = jnp.zeros((E,), dtype=jnp.float32)

    # LSTM params, torch default U(-1/sqrt(H), 1/sqrt(H)); stored pre-transposed.
    bound = 1.0 / jnp.sqrt(float(H))
    w_ih = jax.random.uniform(ks[3], (2 * E, 4 * H), jnp.float32, -bound, bound)
    w_hh = jax.random.uniform(ks[4], (H, 4 * H), jnp.float32, -bound, bound)
    b_ih = jax.random.uniform(ks[5], (4 * H,), jnp.float32, -bound, bound)
    b_hh = jax.random.uniform(ks[6], (4 * H,), jnp.float32, -bound, bound)

    # Non-trivial previous states (also works with states=None).
    h0 = jax.random.normal(ks[7], (1, B, H), dtype=jnp.float32)
    c0 = jax.random.normal(jax.random.fold_in(key, 99), (1, B, H), dtype=jnp.float32)
    states = (h0, c0)

    hiddens, (h_n, c_n) = decoder_e_forward(
        v_g, cell_d, wa, ba, w_ih, w_hh, b_ih, b_hh, states)
    hiddens = jax.block_until_ready(hiddens)

    ref_hiddens, (ref_h, ref_c) = reference_decoder_e(
        v_g, cell_d, wa, ba, w_ih, w_hh, b_ih, b_hh, states)

    assert hiddens.shape == (B, 1, H)
    assert h_n.shape == (1, B, H) and c_n.shape == (1, B, H)
    assert jnp.allclose(hiddens, ref_hiddens, atol=1e-5, rtol=1e-5)
    assert jnp.allclose(h_n, ref_h, atol=1e-5, rtol=1e-5)
    assert jnp.allclose(c_n, ref_c, atol=1e-5, rtol=1e-5)

    # Also exercise the states=None path once.
    hiddens0, _ = decoder_e_forward(v_g, cell_d, wa, ba, w_ih, w_hh, b_ih, b_hh)
    ref0, _ = reference_decoder_e(v_g, cell_d, wa, ba, w_ih, w_hh, b_ih, b_hh)
    assert jnp.allclose(jax.block_until_ready(hiddens0), ref0, atol=1e-5, rtol=1e-5)

    print("KERNEL_OK")
</pallas_src>

<mosaic_0001>
module attributes {stable_mosaic.version = 11 : i64} {
  func.func @decoder_e_kernel(%arg0: i32, %arg1: memref<2x32xf32, #tpu.memory_space<vmem>>, %arg2: memref<2x32xf32, #tpu.memory_space<vmem>>, %arg3: memref<2x32xf32, #tpu.memory_space<vmem>>, %arg4: memref<2x32xf32, #tpu.memory_space<vmem>>, %arg5: memref<32x32xf32, #tpu.memory_space<vmem>>, %arg6: memref<1x32xf32, #tpu.memory_space<vmem>>, %arg7: memref<32x128xf32, #tpu.memory_space<vmem>>, %arg8: memref<32x128xf32, #tpu.memory_space<vmem>>, %arg9: memref<32x128xf32, #tpu.memory_space<vmem>>, %arg10: memref<1x128xf32, #tpu.memory_space<vmem>>, %arg11: memref<2x32xf32, #tpu.memory_space<vmem>>, %arg12: memref<2x32xf32, #tpu.memory_space<vmem>>) attributes {dimension_semantics = [#tpu.dimension_semantics<parallel>], iteration_bounds = array<i64: 1>, scalar_prefetch = 0 : i64, scratch_operands = 0 : i64, tpu.core_type = #tpu.core_type<tc>, window_params = [{transform_indices = @transform_0, window_bounds = array<i64: 2, 32>}, {transform_indices = @transform_1, window_bounds = array<i64: 2, 32>}, {transform_indices = @transform_2, window_bounds = array<i64: 2, 32>}, {transform_indices = @transform_3, window_bounds = array<i64: 2, 32>}, {pipeline_mode = #tpu.pipeline_mode<synchronous>, transform_indices = @transform_4, window_bounds = array<i64: 32, 32>}, {pipeline_mode = #tpu.pipeline_mode<synchronous>, transform_indices = @transform_5, window_bounds = array<i64: 1, 32>}, {pipeline_mode = #tpu.pipeline_mode<synchronous>, transform_indices = @transform_6, window_bounds = array<i64: 32, 128>}, {pipeline_mode = #tpu.pipeline_mode<synchronous>, transform_indices = @transform_7, window_bounds = array<i64: 32, 128>}, {pipeline_mode = #tpu.pipeline_mode<synchronous>, transform_indices = @transform_8, window_bounds = array<i64: 32, 128>}, {pipeline_mode = #tpu.pipeline_mode<synchronous>, transform_indices = @transform_9, window_bounds = array<i64: 1, 128>}, {transform_indices = @transform_10, window_bounds = array<i64: 2, 32>}, {transform_indices = @transform_11, window_bounds = array<i64: 2, 32>}]} {
    %c0 = arith.constant 0 : index
    %c0_0 = arith.constant 0 : index
    %0 = vector.load %arg1[%c0, %c0_0] : memref<2x32xf32, #tpu.memory_space<vmem>>, vector<2x32xf32>
    %c0_1 = arith.constant 0 : index
    %c0_2 = arith.constant 0 : index
    %1 = vector.load %arg2[%c0_1, %c0_2] : memref<2x32xf32, #tpu.memory_space<vmem>>, vector<2x32xf32>
    %c0_3 = arith.constant 0 : index
    %c0_4 = arith.constant 0 : index
    %2 = vector.load %arg3[%c0_3, %c0_4] : memref<2x32xf32, #tpu.memory_space<vmem>>, vector<2x32xf32>
    %c0_5 = arith.constant 0 : index
    %c0_6 = arith.constant 0 : index
    %3 = vector.load %arg4[%c0_5, %c0_6] : memref<2x32xf32, #tpu.memory_space<vmem>>, vector<2x32xf32>
    %c0_7 = arith.constant 0 : index
    %c0_8 = arith.constant 0 : index
    %4 = vector.load %arg5[%c0_7, %c0_8] : memref<32x32xf32, #tpu.memory_space<vmem>>, vector<32x32xf32>
    %cst = arith.constant dense<0.000000e+00> : vector<2x32xf32>
    %5 = tpu.matmul %1, %4, %cst {dimension_numbers = #tpu.dot_dimension_numbers<[1], [0], [0], [1], [0, 0, 1, 1], [], []>} : vector<2x32xf32>, vector<32x32xf32>, vector<2x32xf32> -> vector<2x32xf32>
    %c0_9 = arith.constant 0 : index
    %c0_10 = arith.constant 0 : index
    %6 = vector.load %arg6[%c0_9, %c0_10] : memref<1x32xf32, #tpu.memory_space<vmem>>, vector<1x32xf32>
    %7 = vector.broadcast %6 : vector<1x32xf32> to vector<2x32xf32>
    %8 = arith.addf %5, %7 : vector<2x32xf32>
    %c0_11 = arith.constant 0 : index
    %c0_12 = arith.constant 0 : index
    %9 = vector.load %arg7[%c0_11, %c0_12] : memref<32x128xf32, #tpu.memory_space<vmem>>, vector<32x128xf32>
    %cst_13 = arith.constant dense<0.000000e+00> : vector<2x128xf32>
    %10 = tpu.matmul %8, %9, %cst_13 {dimension_numbers = #tpu.dot_dimension_numbers<[1], [0], [0], [1], [0, 0, 1, 1], [], []>} : vector<2x32xf32>, vector<32x128xf32>, vector<2x128xf32> -> vector<2x128xf32>
    %c0_14 = arith.constant 0 : index
    %c0_15 = arith.constant 0 : index
    %11 = vector.load %arg8[%c0_14, %c0_15] : memref<32x128xf32, #tpu.memory_space<vmem>>, vector<32x128xf32>
    %cst_16 = arith.constant dense<0.000000e+00> : vector<2x128xf32>
    %12 = tpu.matmul %0, %11, %cst_16 {dimension_numbers = #tpu.dot_dimension_numbers<[1], [0], [0], [1], [0, 0, 1, 1], [], []>} : vector<2x32xf32>, vector<32x128xf32>, vector<2x128xf32> -> vector<2x128xf32>
    %13 = arith.addf %10, %12 : vector<2x128xf32>
    %c0_17 = arith.constant 0 : index
    %c0_18 = arith.constant 0 : index
    %14 = vector.load %arg9[%c0_17, %c0_18] : memref<32x128xf32, #tpu.memory_space<vmem>>, vector<32x128xf32>
    %cst_19 = arith.constant dense<0.000000e+00> : vector<2x128xf32>
    %15 = tpu.matmul %2, %14, %cst_19 {dimension_numbers = #tpu.dot_dimension_numbers<[1], [0], [0], [1], [0, 0, 1, 1], [], []>} : vector<2x32xf32>, vector<32x128xf32>, vector<2x128xf32> -> vector<2x128xf32>
    %16 = arith.addf %13, %15 : vector<2x128xf32>
    %c0_20 = arith.constant 0 : index
    %c0_21 = arith.constant 0 : index
    %17 = vector.load %arg10[%c0_20, %c0_21] : memref<1x128xf32, #tpu.memory_space<vmem>>, vector<1x128xf32>
    %18 = vector.broadcast %17 : vector<1x128xf32> to vector<2x128xf32>
    %19 = arith.addf %16, %18 : vector<2x128xf32>
    %20 = vector.extract_strided_slice %19 {offsets = [0, 0], sizes = [2, 32], strides = [1, 1]} : vector<2x128xf32> to vector<2x32xf32>
    %cst_22 = arith.constant 0.000000e+00 : f32
    %21 = vector.broadcast %cst_22 : f32 to vector<2x32xf32>
    %22 = arith.subf %21, %20 : vector<2x32xf32>
    %23 = math.exp %22 : vector<2x32xf32>
    %cst_23 = arith.constant 1.000000e+00 : f32
    %24 = vector.broadcast %cst_23 : f32 to vector<2x32xf32>
    %25 = arith.addf %24, %23 : vector<2x32xf32>
    %cst_24 = arith.constant 1.000000e+00 : f32
    %26 = vector.broadcast %cst_24 : f32 to vector<2x32xf32>
    %27 = arith.divf %26, %25 : vector<2x32xf32>
    %28 = vector.extract_strided_slice %19 {offsets = [0, 32], sizes = [2, 32], strides = [1, 1]} : vector<2x128xf32> to vector<2x32xf32>
    %cst_25 = arith.constant 0.000000e+00 : f32
    %29 = vector.broadcast %cst_25 : f32 to vector<2x32xf32>
    %30 = arith.subf %29, %28 : vector<2x32xf32>
    %31 = math.exp %30 : vector<2x32xf32>
    %cst_26 = arith.constant 1.000000e+00 : f32
    %32 = vector.broadcast %cst_26 : f32 to vector<2x32xf32>
    %33 = arith.addf %32, %31 : vector<2x32xf32>
    %cst_27 = arith.constant 1.000000e+00 : f32
    %34 = vector.broadcast %cst_27 : f32 to vector<2x32xf32>
    %35 = arith.divf %34, %33 : vector<2x32xf32>
    %36 = vector.extract_strided_slice %19 {offsets = [0, 64], sizes = [2, 32], strides = [1, 1]} : vector<2x128xf32> to vector<2x32xf32>
    %37 = math.tanh %36 : vector<2x32xf32>
    %38 = vector.extract_strided_slice %19 {offsets = [0, 96], sizes = [2, 32], strides = [1, 1]} : vector<2x128xf32> to vector<2x32xf32>
    %cst_28 = arith.constant 0.000000e+00 : f32
    %39 = vector.broadcast %cst_28 : f32 to vector<2x32xf32>
    %40 = arith.subf %39, %38 : vector<2x32xf32>
    %41 = math.exp %40 : vector<2x32xf32>
    %cst_29 = arith.constant 1.000000e+00 : f32
    %42 = vector.broadcast %cst_29 : f32 to vector<2x32xf32>
    %43 = arith.addf %42, %41 : vector<2x32xf32>
    %cst_30 = arith.constant 1.000000e+00 : f32
    %44 = vector.broadcast %cst_30 : f32 to vector<2x32xf32>
    %45 = arith.divf %44, %43 : vector<2x32xf32>
    %46 = arith.mulf %35, %3 : vector<2x32xf32>
    %47 = arith.mulf %27, %37 : vector<2x32xf32>
    %48 = arith.addf %46, %47 : vector<2x32xf32>
    %49 = math.tanh %48 : vector<2x32xf32>
    %50 = arith.mulf %45, %49 : vector<2x32xf32>
    %c0_31 = arith.constant 0 : index
    %c0_32 = arith.constant 0 : index
    %51 = vector.load %arg11[%c0_31, %c0_32] : memref<2x32xf32, #tpu.memory_space<vmem>>, vector<2x32xf32>
    tpu.vector_store %arg11[%c0_31, %c0_32], %50 {strides = array<i32>} : memref<2x32xf32, #tpu.memory_space<vmem>>, vector<2x32xf32>,
    %c0_33 = arith.constant 0 : index
    %c0_34 = arith.constant 0 : index
    %52 = vector.load %arg12[%c0_33, %c0_34] : memref<2x32xf32, #tpu.memory_space<vmem>>, vector<2x32xf32>
    tpu.vector_store %arg12[%c0_33, %c0_34], %48 {strides = array<i32>} : memref<2x32xf32, #tpu.memory_space<vmem>>, vector<2x32xf32>,
    return
  }
  func.func @transform_0(%arg0: i32) -> (i32, i32) {
    %c0_i32 = arith.constant 0 : i32
    %c0_i32_0 = arith.constant 0 : i32
    return %arg0, %c0_i32 : i32, i32
  }
  func.func @transform_1(%arg0: i32) -> (i32, i32) {
    %c0_i32 = arith.constant 0 : i32
    %c0_i32_0 = arith.constant 0 : i32
    return %arg0, %c0_i32 : i32, i32
  }
  func.func @transform_2(%arg0: i32) -> (i32, i32) {
    %c0_i32 = arith.constant 0 : i32
    %c0_i32_0 = arith.constant 0 : i32
    return %arg0, %c0_i32 : i32, i32
  }
  func.func @transform_3(%arg0: i32) -> (i32, i32) {
    %c0_i32 = arith.constant 0 : i32
    %c0_i32_0 = arith.constant 0 : i32
    return %arg0, %c0_i32 : i32, i32
  }
  func.func @transform_4(%arg0: i32) -> (i32, i32) {
    %c0_i32 = arith.constant 0 : i32
    %c0_i32_0 = arith.constant 0 : i32
    %c0_i32_1 = arith.constant 0 : i32
    return %c0_i32, %c0_i32_0 : i32, i32
  }
  func.func @transform_5(%arg0: i32) -> (i32, i32) {
    %c0_i32 = arith.constant 0 : i32
    %c0_i32_0 = arith.constant 0 : i32
    %c0_i32_1 = arith.constant 0 : i32
    return %c0_i32, %c0_i32_0 : i32, i32
  }
  func.func @transform_6(%arg0: i32) -> (i32, i32) {
    %c0_i32 = arith.constant 0 : i32
    %c0_i32_0 = arith.constant 0 : i32
    %c0_i32_1 = arith.constant 0 : i32
    return %c0_i32, %c0_i32_0 : i32, i32
  }
  func.func @transform_7(%arg0: i32) -> (i32, i32) {
    %c0_i32 = arith.constant 0 : i32
    %c0_i32_0 = arith.constant 0 : i32
    %c0_i32_1 = arith.constant 0 : i32
    return %c0_i32, %c0_i32_0 : i32, i32
  }
  func.func @transform_8(%arg0: i32) -> (i32, i32) {
    %c0_i32 = arith.constant 0 : i32
    %c0_i32_0 = arith.constant 0 : i32
    %c0_i32_1 = arith.constant 0 : i32
    return %c0_i32, %c0_i32_0 : i32, i32
  }
  func.func @transform_9(%arg0: i32) -> (i32, i32) {
    %c0_i32 = arith.constant 0 : i32
    %c0_i32_0 = arith.constant 0 : i32
    %c0_i32_1 = arith.constant 0 : i32
    return %c0_i32, %c0_i32_0 : i32, i32
  }
  func.func @transform_10(%arg0: i32) -> (i32, i32) {
    %c0_i32 = arith.constant 0 : i32
    %c0_i32_0 = arith.constant 0 : i32
    return %arg0, %c0_i32 : i32, i32
  }
  func.func @transform_11(%arg0: i32) -> (i32, i32) {
    %c0_i32 = arith.constant 0 : i32
    %c0_i32_0 = arith.constant 0 : i32
    return %arg0, %c0_i32 : i32, i32
  }
}

</mosaic_0001>

<bundles_post_ra>
// kernel: tpu_custom_call.1
= control target key start
LH: loop header
LB: loop body
LE: loop exit
PB: predicated region body
PF: predicated region fallthrough
CT: control target
= control target key end

     0   :  { %17 = vsyncpa [#allocation3], 0  ;;  %s981_s0 = inlined_call_operand.hbm [shape: f32[2,32], index: 0, kind: input, shape index: {}]   ;;  %s982_s1 = inlined_call_operand.vmem [shape: f32[2,32], index: 1, kind: input, shape index: {}]   ;;  %s983_s2 = inlined_call_operand.vmem [shape: f32[2,32], index: 2, kind: input, shape index: {}]   ;;  %s984_s3 = inlined_call_operand.vmem [shape: f32[2,32], index: 3, kind: input, shape index: {}]   ;;  %s985_s4 = inlined_call_operand.hbm [shape: f32[32,32], index: 4, kind: input, shape index: {}]   ;;  %s986_s5 = inlined_call_operand.vmem [shape: f32[1,32], index: 5, kind: input, shape index: {}]   ;;  %s987_s6 = inlined_call_operand.hbm [shape: f32[32,128], index: 6, kind: input, shape index: {}]   ;;  %s988_s7 = inlined_call_operand.hbm [shape: f32[32,128], index: 7, kind: input, shape index: {}]   ;;  %s989_s8 = inlined_call_operand.hbm [shape: f32[32,128], index: 8, kind: input, shape index: {}]   ;;  %s990_s9 = inlined_call_operand.vmem [shape: f32[1,128], index: 9, kind: input, shape index: {}]   ;;  %s991_s10 = inlined_call_operand.hbm [shape: f32[2,32], index: 10, kind: output, shape index: {0}]   ;;  %s992_s11 = inlined_call_operand.hbm [shape: f32[2,32], index: 11, kind: output, shape index: {1}]  }
   0x1   :  { %18 = vsyncpa [#allocation6], 0 }
   0x2   :  { %19 = vsyncpa [#allocation9], 0 }
   0x3   :  { %20 = vsyncpa [#allocation4], 0 }
   0x4   :  { %21 = vsyncpa [#allocation13], 0  ;;  %s785_s17 = smov [#allocation5]   ;;  %s621_s21 = scalar_lea.hbm %s985_s4, 512 }
   0x5   :  { %s43_s18 = sshll.u32 %s785_s17, 4  ;;  %p622_p0 = scmp.ne.s32.totalorder %s985_s4, %s621_s21  ;;  %s44_s18 = int_to_ptr.vmem [resolvable:$true] %s43_s18 }
   0x6   :  { %p625_p1 = scmp.lt.u32.totalorder %s621_s21, %s985_s4 }
   0x8   :  { %p627_p2 = pnand %p625_p1, %p622_p0 }
   0xa   :  { %630 = shalt.err (!%p627_p2)
}
   0xb   :  { %s631_s26 = scalar_lea.vmem %s44_s18, 512  ;;  %p636_p4 = scmp.lt.s32.totalorder %s44_s18, %s44_s18 }
   0xc   :  { %p632_p3 = scmp.ne.s32.totalorder %s44_s18, %s631_s26  ;;  %p637_p5 = scmp.lt.s32.totalorder %s631_s26, %s631_s26 }
   0xe   :  { %p638_p6 = por %p637_p5, %p636_p4 }
  0x10   :  { %p639_p7 = pnand %p638_p6, %p632_p3 }
  0x12   :  { %642 = shalt.err (!%p639_p7)
}
  0x13   :  { %s786_s27 = smov 128   ;;  %s787_s28 = smov 8  }
  0x14   :  { %49 = dma.hbm_to_vmem [thread:$0]  %s985_s4, 512, %s44_s18, [#allocation6], %s786_s27, %s786_s27, %s787_s28  }
  0x15   :  { %s788_s12 = smov [#allocation8]   ;;  %s789_s14 = smov [#allocation2]  }
  0x16   :  { %s69_s13 = sshll.u32 %s788_s12, 4  ;;  %s28_s15 = sshll.u32 %s789_s14, 4  ;;  %s70_s13 = int_to_ptr.vmem [resolvable:$true] %s69_s13  ;;  %s29_s15 = int_to_ptr.vmem [resolvable:$true] %s28_s15 }
  0x17   :  { %s643_s19 = scalar_lea.hbm %s988_s7, 512 }
  0x18   :  { %p644_p8 = scmp.ne.s32.totalorder %s988_s7, %s643_s19  ;;  %p647_p9 = scmp.lt.u32.totalorder %s643_s19, %s988_s7 }
  0x1a   :  { %p649_p10 = pnand %p647_p9, %p644_p8 }
  0x1c   :  { %652 = shalt.err (!%p649_p10)
}
  0x1d   :  { %s653_s4 = scalar_lea.vmem %s70_s13, 512  ;;  %p658_p12 = scmp.lt.s32.totalorder %s70_s13, %s70_s13 }
  0x1e   :  { %p654_p11 = scmp.ne.s32.totalorder %s70_s13, %s653_s4  ;;  %p659_p13 = scmp.lt.s32.totalorder %s653_s4, %s653_s4 }
  0x20   :  { %p660_p0 = por %p659_p13, %p658_p12 }
  0x22   :  { %p661_p1 = pnand %p660_p0, %p654_p11 }
  0x24   :  { %664 = shalt.err (!%p661_p1)
}
  0x25   :  { %75 = dma.hbm_to_vmem [thread:$0]  %s988_s7, 512, %s70_s13, [#allocation9], %s786_s27, %s786_s27, %s787_s28  }
  0x26   :  { %s665_s29 = scalar_lea.hbm %s981_s0, 32 }
  0x27   :  { %p666_p2 = scmp.ne.s32.totalorder %s981_s0, %s665_s29  ;;  %p669_p3 = scmp.lt.u32.totalorder %s665_s29, %s981_s0 }
  0x29   :  { %p671_p4 = pnand %p669_p3, %p666_p2 }
  0x2b   :  { %674 = shalt.err (!%p671_p4)
}
  0x2c   :  { %s675_s17 = scalar_lea.vmem %s29_s15, 32  ;;  %p680_p6 = scmp.lt.s32.totalorder %s29_s15, %s29_s15 }
  0x2d   :  { %p676_p5 = scmp.ne.s32.totalorder %s29_s15, %s675_s17  ;;  %p681_p7 = scmp.lt.s32.totalorder %s675_s17, %s675_s17 }
  0x2f   :  { %p682_p8 = por %p681_p7, %p680_p6 }
  0x31   :  { %p683_p9 = pnand %p682_p8, %p676_p5 }
  0x33   :  { %686 = shalt.err (!%p683_p9)
}
  0x34   :  { %31 = dma.hbm_to_vmem [thread:$0]  %s981_s0, 32, %s29_s15, [#allocation3]  }
  0x35   :  { %s790_s19 = smov [#allocation7]   ;;  %s791_s21 = smov [#allocation10]  }
  0x36   :  { %s57_s20 = sshll.u32 %s790_s19, 4  ;;  %s81_s22 = sshll.u32 %s791_s21, 4  ;;  %s58_s20 = int_to_ptr.vmem [resolvable:$true] %s57_s20  ;;  %s82_s22 = int_to_ptr.vmem [resolvable:$true] %s81_s22 }
  0x37   :  { %s687_s18 = scalar_lea.hbm %s987_s6, 512 }
  0x38   :  { %p688_p10 = scmp.ne.s32.totalorder %s987_s6, %s687_s18  ;;  %p691_p11 = scmp.lt.u32.totalorder %s687_s18, %s987_s6 }
  0x3a   :  { %p693_p12 = pnand %p691_p11, %p688_p10 }
  0x3c   :  { %696 = shalt.err (!%p693_p12)
}
  0x3d   :  { %s697_s0 = scalar_lea.vmem %s58_s20, 512  ;;  %p702_p0 = scmp.lt.s32.totalorder %s58_s20, %s58_s20 }
  0x3e   :  { %p698_p13 = scmp.ne.s32.totalorder %s58_s20, %s697_s0  ;;  %p703_p1 = scmp.lt.s32.totalorder %s697_s0, %s697_s0 }
  0x40   :  { %p704_p2 = por %p703_p1, %p702_p0 }
  0x42   :  { %p705_p3 = pnand %p704_p2, %p698_p13 }
  0x44   :  { %708 = shalt.err (!%p705_p3)
}
  0x45   :  { %63 = dma.hbm_to_vmem [thread:$0]  %s987_s6, 512, %s58_s20, [#allocation6], %s786_s27, %s786_s27, %s787_s28  }
  0x46   :  { %s709_s16 = scalar_lea.hbm %s989_s8, 512 }
  0x47   :  { %p710_p4 = scmp.ne.s32.totalorder %s989_s8, %s709_s16  ;;  %p713_p5 = scmp.lt.u32.totalorder %s709_s16, %s989_s8 }
  0x49   :  { %p715_p6 = pnand %p713_p5, %p710_p4 }
  0x4b   :  { %718 = shalt.err (!%p715_p6)
}
  0x4c   :  { %s719_s21 = scalar_lea.vmem %s82_s22, 512  ;;  %p724_p8 = scmp.lt.s32.totalorder %s82_s22, %s82_s22 }
  0x4d   :  { %p720_p7 = scmp.ne.s32.totalorder %s82_s22, %s719_s21  ;;  %p725_p9 = scmp.lt.s32.totalorder %s719_s21, %s719_s21 }
  0x4f   :  { %p726_p10 = por %p725_p9, %p724_p8 }
  0x51   :  { %p727_p11 = pnand %p726_p10, %p720_p7 }
  0x53   :  { %730 = shalt.err (!%p727_p11)
}
  0x54   :  { %87 = dma.hbm_to_vmem [thread:$0]  %s989_s8, 512, %s82_s22, [#allocation9], %s786_s27, %s786_s27, %s787_s28  }
  0x55   :  { %775 = dma.done.wait [#allocation3], 32  }
  0x56   :  { %776 = vsyncadd [#allocation3], 4294967264 }
  0x57   :  { %777 = dma.done.wait [#allocation6], 1024  }
  0x58   :  { %778 = vsyncadd [#allocation6], 4294966272 }
  0x59   :  { %779 = dma.done.wait [#allocation9], 1024  }
  0x5a   :  { %780 = vsyncadd [#allocation9], 4294966272  ;;  %v792_v0 = vmov 0.0|0.0   ;;  %vm793_vm0 = vmmov 0   ;;  %v794_v1 = vmov 0.0   ;;  %v109_v2 = vld [vmem:[#allocation5] sm:$0xff] }
  0x5b   :  { %574 = vmatprep.subr.bf16.mxu0 %v792_v0  ;;  %538 = vmatprep.mubr.msk.f32.mxu0 %vm793_vm0, %v794_v1  ;;  %v110_v3 = vld [vmem:[#allocation5 + $0x8] sm:$0xff]  ;;  %v111_v4 = vld [vmem:[#allocation5 + $0x10] sm:$0xff]  ;;  %v112_v6 = vld [vmem:[#allocation5 + $0x18] sm:$0xff]  ;;  %vm120_vm1 = vcmask 261120   ;;  %s796_s25 = smov 32   ;;  %vm466_vm2 = vcmask 254976  }
  0x5c   :  { %580 = vmatprep.subr.bf16.mxu1 %v792_v0  ;;  %549 = vmatprep.mubr.msk.f32.mxu1 %vm793_vm0, %v794_v1  ;;  %v575_v5 = vpack.c.bf16 %v110_v3, %v109_v2  ;;  %v198_v7 = vld [vmem:[#allocation8] sm:$0xff]  ;;  %v199_v8 = vld [vmem:[#allocation8 + $0x8] sm:$0xff]  ;;  %v200_v9 = vld [vmem:[#allocation8 + $0x10] sm:$0xff]  ;;  %v578_v11 = vpack.c.bf16 %v112_v6, %v111_v4 }
  0x5d   :  { %v201_v10 = vld [vmem:[#allocation8 + $0x18] sm:$0xff]  ;;  %v581_v12 = vpack.c.bf16 %v199_v8, %v198_v7  ;;  %v194_v13 = vld [vmem:[#allocation7] sm:$0xff]  ;;  %v195_v14 = vld [vmem:[#allocation7 + $0x8] sm:$0xff] }
  0x5e   :  { %576 = vmatpush3.bf16.msra.mxu0 %v575_v5  ;;  %v584_v15 = vpack.c.bf16 %v201_v10, %v200_v9  ;;  %v348_v16 = vld [vmem:[#allocation10] sm:$0xff]  ;;  %v349_v17 = vld [vmem:[#allocation10 + $0x8] sm:$0xff]  ;;  %v106_v18 = vld [vmem:[%s982_s1] sm:$0x3]  ;;  %v587_v19 = vpack.c.bf16 %v195_v14, %v194_v13 }
  0x5f   :  { %577 = vmatprep.subr.bf16.mxu0 %v792_v0  ;;  %582 = vmatpush3.bf16.msra.mxu1 %v581_v12  ;;  %v105_v20 = vld [vmem:[#allocation2] sm:$0x3]  ;;  %v593_v21 = vpack.c.bf16 %v349_v17, %v348_v16  ;;  %v196_v22 = vld [vmem:[#allocation7 + $0x10] sm:$0xff] }
  0x60   :  { %583 = vmatprep.subr.bf16.mxu1 %v792_v0  ;;  %v197_v23 = vld [vmem:[#allocation7 + $0x18] sm:$0xff]  ;;  %v350_v25 = vld [vmem:[#allocation10 + $0x10] sm:$0xff] }
  0x61   :  { %v590_v24 = vpack.c.bf16 %v197_v23, %v196_v22  ;;  %v351_v26 = vld [vmem:[#allocation10 + $0x18] sm:$0xff] }
  0x62   :  { %579 = vmatpush3.bf16.msra.mxu0 %v578_v11  ;;  %v596_v27 = vpack.c.bf16 %v351_v26, %v350_v25  ;;  %v107_v28 = vld [vmem:[%s983_s2] sm:$0x3] }
  0x63   :  { %586 = vmatprep.subr.bf16.mxu0 %v792_v0  ;;  %585 = vmatpush3.bf16.msra.mxu1 %v584_v15  ;;  %v504_v29 = vld [vmem:[%s986_s5] ss:$0 sm:$0xff]  ;;  %s795_s5 = smov 64  }
  0x64   :  { %592 = vmatprep.subr.bf16.mxu1 %v792_v0  ;;  %v509_v40 = vld [vmem:[%s990_s9] ss:$0 sm:$0xff]  ;;  %s798_s9 = smov [#allocation12]  }
  0x65   :  { %539 = vmatmul.mubr.msk.f32.vlgmr.msra.gmra.mrb[0].mxu0 %vm120_vm1, %v106_v18  ;;  %v108_v44 = vld [vmem:[%s984_s3] sm:$0x3]  ;;  %s797_s3 = smov 96   ;;  %s489_s26 = sshll.u32 %s798_s9, 4  ;;  %s490_s26 = int_to_ptr.vmem [resolvable:$true] %s489_s26 }
  0x66   :  { %588 = vmatpush3.bf16.msra.mxu0 %v587_v19  ;;  %560 = vmatprep.mubr.msk.f32.mxu0 %vm793_vm0, %v794_v1  ;;  %s731_s29 = scalar_lea.vmem %s490_s26, 32  ;;  %p736_p13 = scmp.lt.s32.totalorder %s490_s26, %s490_s26 }
  0x67   :  { %550 = vmatmul.mubr.msk.f32.vlgmr.msra.gmra.mrb[0].mxu1 %vm120_vm1, %v105_v20  ;;  %589 = vmatprep.subr.bf16.mxu0 %v792_v0  ;;  %p732_p12 = scmp.ne.s32.totalorder %s490_s26, %s731_s29  ;;  %p737_p0 = scmp.lt.s32.totalorder %s731_s29, %s731_s29 }
  0x68   :  { %594 = vmatpush3.bf16.msra.mxu1 %v593_v21  ;;  %571 = vmatprep.mubr.msk.f32.mxu1 %vm793_vm0, %v794_v1 }
  0x69   :  { %595 = vmatprep.subr.bf16.mxu1 %v792_v0  ;;  %p738_p1 = por %p737_p0, %p736_p13 }
  0x6a   :  { %591 = vmatpush3.bf16.msra.mxu0 %v590_v24 }
  0x6b   :  { %p739_p2 = pnand %p738_p1, %p732_p12 }
  0x6c   :  { %597 = vmatpush3.bf16.msra.mxu1 %v596_v27 }
  0x6f   :  { %572 = vmatmul.mubr.msk.f32.vlgmr.msra.gmra.mrb[2].mxu1 %vm120_vm1, %v107_v28 }
 0x138   :  { %v190_v30 = vpop.f32.mrb[0].mxu0 }
 0x139   :  { %v191_v31 = vadd.f32 %v504_v29, %v190_v30  ;;  %v540_v32 = vpop.f32.mrb[1].mxu0 }
 0x13a   :  { %v271_v33 = vpop.f32.mrb[0].mxu1 }
 0x13b   :  { %561 = vmatmul.mubr.msk.f32.vlgmr.msra.gmra.mrb[2].mxu0 %vm120_vm1, %v191_v31  ;;  %v551_v34 = vpop.f32.mrb[1].mxu1 }
 0x142   :  { %v421_v35 = vpop.f32.mrb[2].mxu1 }
 0x143   :  { %v573_v36 = vpop.f32.mrb[3].mxu1 }
 0x20e   :  { %v344_v37 = vpop.f32.mrb[2].mxu0 }
 0x20f   :  { %v345_v38 = vadd.f32 %v344_v37, %v271_v33  ;;  %v562_v39 = vpop.f32.mrb[3].mxu0 }
 0x211   :  { %v425_v41 = vadd.f32 %v421_v35, %v345_v38 }
 0x213   :  { %v433_v42 = vadd.f32 %v509_v40, %v425_v41 }
 0x215   :  { %613 = vtanh.f32 %v433_v42  ;;  %v434_v45 = vsub.f32 0.0, %v433_v42 }
 0x217   :  { %v435_v46 = vmul.f32 1.442695, %v434_v45 }
 0x219   :  { %615 = vpow2.f32 %v435_v46 }
 0x21f   :  { %v614_v43 = vpop.eup %613 }
 0x220   :  { %447 = vrot.lane.b32.xlu0 %v614_v43, %s795_s5 }
 0x223   :  { %v616_v47 = vpop.eup %615 }
 0x224   :  { %442 = vrot.lane.b32.xlu0 %v108_v44, %s796_s25  ;;  %v437_v48 = vadd.f32 1.0, %v616_v47 }
 0x226   :  { %617 = vrcp.f32 %v437_v48 }
 0x230   :  { %v618_v49 = vpop.eup %617 }
 0x292   :  { %v448_v50 = vpop.permute.xlu0 %447 }
 0x293   :  { %v450_v51 = vmul.f32 %v618_v49, %v448_v50 }
 0x295   :  { %452 = vrot.lane.b32.xlu1 %v450_v51, %s796_s25 }
 0x296   :  { %v443_v52 = vpop.permute.xlu0 %442 }
 0x297   :  { %v445_v53 = vmul.f32 %v618_v49, %v443_v52 }
 0x307   :  { %v453_v54 = vpop.permute.xlu1 %452 }
 0x308   :  { %v455_v55 = vadd.f32 %v453_v54, %v445_v53 }
 0x30a   :  { %619 = vtanh.f32 %v455_v55 }
 0x314   :  { %v620_v56 = vpop.eup %619 }
 0x315   :  { %458 = vrot.lane.b32.xlu1 %v620_v56, %s795_s5 }
 0x319   :  { %469 = vrot.lane.b32.xlu1 %v455_v55, %s797_s3 }
 0x387   :  { %v459_v57 = vpop.permute.xlu1 %458 }
 0x388   :  { %v461_v58 = vmul.f32 %v618_v49, %v459_v57 }
 0x38a   :  { %463 = vrot.lane.b32.xlu0 %v461_v58, %s796_s25 }
 0x38b   :  { %v470_v59 = vpop.permute.xlu1 %469 }
 0x38c   :  { %472 = vst.msk [vmem:[#allocation12] sm:$0x3] %vm466_vm2, %v470_v59 }
 0x38d   :  { %742 = shalt.err (!%p739_p2)
}
 0x38e   :  { %s743_s30 = scalar_lea.hbm %s992_s11, 32 }
 0x38f   :  { %p744_p3 = scmp.ne.s32.totalorder %s992_s11, %s743_s30  ;;  %p747_p4 = scmp.lt.u32.totalorder %s743_s30, %s992_s11 }
 0x391   :  { %p749_p5 = pnand %p747_p4, %p744_p3 }
 0x393   :  { %752 = shalt.err (!%p749_p5)
}
 0x394   :  { %492 = dma.vmem_to_hbm [thread:$0]  %s490_s26, 32, %s992_s11, [#allocation13]  }
 0x395   :  { %s799_s19 = smov [#allocation11]  }
 0x396   :  { %s479_s21 = sshll.u32 %s799_s19, 4  ;;  %s480_s21 = int_to_ptr.vmem [resolvable:$true] %s479_s21 }
 0x397   :  { %s753_s6 = scalar_lea.vmem %s480_s21, 32  ;;  %p758_p7 = scmp.lt.s32.totalorder %s480_s21, %s480_s21 }
 0x398   :  { %p754_p6 = scmp.ne.s32.totalorder %s480_s21, %s753_s6  ;;  %p759_p8 = scmp.lt.s32.totalorder %s753_s6, %s753_s6 }
 0x39a   :  { %p760_p9 = por %p759_p8, %p758_p7 }
 0x39c   :  { %p761_p10 = pnand %p760_p9, %p754_p6 }
 0x3fc   :  { %v464_v60 = vpop.permute.xlu0 %463 }
 0x3fd   :  { %467 = vst.msk [vmem:[#allocation11] sm:$0x3] %vm466_vm2, %v464_v60 }
 0x3fe   :  { %764 = shalt.err (!%p761_p10)
}
 0x3ff   :  { %s765_s27 = scalar_lea.hbm %s991_s10, 32 }
 0x400   :  { %p766_p11 = scmp.ne.s32.totalorder %s991_s10, %s765_s27  ;;  %p769_p12 = scmp.lt.u32.totalorder %s765_s27, %s991_s10 }
 0x402   :  { %p771_p13 = pnand %p769_p12, %p766_p11 }
 0x404   :  { %774 = shalt.err (!%p771_p13)
}
 0x405   :  { %482 = dma.vmem_to_hbm [thread:$0]  %s480_s21, 32, %s991_s10, [#allocation4]  }
 0x406   :  { %781 = dma.done.wait [#allocation4], 32  }
 0x407   :  { %782 = vsyncadd [#allocation4], 4294967264 }
 0x408   :  { %783 = dma.done.wait [#allocation13], 32  }
 0x409   :  { %784 = vsyncadd [#allocation13], 4294967264 }
 0x40a   :  { %499 = vsyncpa [#allocation3], 1 }
 0x40b   :  { %500 = vsyncpa [#allocation6], 1 }
 0x40c   :  { %501 = vsyncpa [#allocation9], 1 }
 0x40d   :  { %502 = vsyncpa [#allocation4], 1 }
 0x40e   :  { %503 = vsyncpa [#allocation13], 1 }

</bundles_post_ra>
